<compile_context>
chip_gen: v7x
topology: tpu7x:2x2x1
jax: 0.10.0
libtpu: 0.0.40
codegen_flags: <defaults>
</compile_context>

<pallas_src>
import functools

import jax
import jax.numpy as jnp
from jax.experimental import pallas as pl
from jax.experimental.pallas import tpu as pltpu


def _sigmoid(x):
    # Exact sigmoid via EUP tanh (no VALU divide): 1/(1+e^-x) == 0.5*(tanh(x/2)+1)
    return 0.5 * (jnp.tanh(0.5 * x) + 1.0)


def _softplus(x):
    # Matches torch.nn.Softplus (beta=1, threshold=20)
    return jnp.where(x > 20.0, x, jnp.log1p(jnp.exp(jnp.minimum(x, 20.0))))


def _decoder_kernel(x_ref, noise_ref,
                    w1_ref, b1_ref, w2c_ref, b2c_ref,
                    w3_ref, b3_ref, w4c_ref, b4c_ref,
                    out_ref,
                    *, z_dim, n_ev, out_width, compute_dtype):
    eps = 1e-8
    rows = out_ref.shape[0]

    x = x_ref[...]  # already cast to compute_dtype in the wrapper

    # ---- encode: fc1 -> SiLU ----
    h1 = (jnp.dot(x, w1_ref[...], preferred_element_type=jnp.float32)
          + b1_ref[...])
    h1 = h1 * _sigmoid(h1)                                        # SiLU (f32)

    # ---- fused fc21 | fc22 ----
    h2 = (jnp.dot(h1.astype(compute_dtype), w2c_ref[...],
                  preferred_element_type=jnp.float32) + b2c_ref[...])
    mu = h2[:, :z_dim]
    logvar = _softplus(h2[:, z_dim:]) + eps

    # ---- reparameterize: z = mu + eps * std ----
    z = mu + noise_ref[...] * jnp.exp(0.5 * logvar)

    # ---- decode: fc3 -> sigmoid ----
    h3 = _sigmoid(jnp.dot(z.astype(compute_dtype), w3_ref[...],
                          preferred_element_type=jnp.float32) + b3_ref[...])

    # ---- fused fc4_time | fc4_mark ----
    h4 = (jnp.dot(h3.astype(compute_dtype), w4c_ref[...],
                  preferred_element_type=jnp.float32) + b4c_ref[...])
    time_logits = h4[:, 0:1]
    mark = h4[:, 1:]

    # ---- stable log_softmax over marks ----
    m = jnp.max(mark, axis=-1, keepdims=True)
    shifted = mark - m
    logp = shifted - jnp.log(jnp.sum(jnp.exp(shifted), axis=-1, keepdims=True))

    # ---- packed, lane-dense output slab: [time | mark | mu | logvar | pad] --
    out_cols = 1 + n_ev + 2 * z_dim
    out_ref[:, 0:1] = time_logits
    out_ref[:, 1:1 + n_ev] = logp
    out_ref[:, 1 + n_ev:1 + n_ev + z_dim] = mu
    out_ref[:, 1 + n_ev + z_dim:out_cols] = logvar
    if out_width > out_cols:
        out_ref[:, out_cols:] = jnp.zeros((rows, out_width - out_cols),
                                          jnp.float32)


def _round_up(a, b):
    return ((a + b - 1) // b) * b


def vae_tpp_decoder_forward(hidden_states, noise, params, *, row_tile=256,
                            compute_dtype=jnp.bfloat16):
    """hidden_states: [..., n_in] f32; noise: [..., z_dim] f32 std-normal."""
    lead = hidden_states.shape[:-1]
    n_in = hidden_states.shape[-1]
    n_hid = params["w1"].shape[1]
    z_dim = params["w21"].shape[1]
    n_ev = params["w4m"].shape[1]

    x = hidden_states.reshape(-1, n_in)
    eps_noise = noise.reshape(-1, z_dim)
    n_rows = x.shape[0]

    # Large row tiles; pad the row count, drop padded rows after the call.
    # (Keeps the grid >= 2 for production-size N so both v7x cores get work.)
    rt = max(8, _round_up(min(row_tile, _round_up(n_rows, 8)), 8))
    n_padded = _round_up(n_rows, rt)
    if n_padded != n_rows:
        pad = n_padded - n_rows
        x = jnp.pad(x, ((0, pad), (0, 0)))
        eps_noise = jnp.pad(eps_noise, ((0, pad), (0, 0)))

    x = x.astype(compute_dtype)
    eps_noise = eps_noise.astype(jnp.float32)

    # Fused weights (fc21|fc22 and fc4_time|fc4_mark); MXU operands in bf16,
    # biases kept f32.
    w1 = params["w1"].astype(compute_dtype)
    b1 = params["b1"].astype(jnp.float32)
    w2c = jnp.concatenate([params["w21"], params["w22"]], axis=1).astype(compute_dtype)
    b2c = jnp.concatenate([params["b21"], params["b22"]], axis=1).astype(jnp.float32)
    w3 = params["w3"].astype(compute_dtype)
    b3 = params["b3"].astype(jnp.float32)
    w4c = jnp.concatenate([params["w4t"], params["w4m"]], axis=1).astype(compute_dtype)
    b4c = jnp.concatenate([params["b4t"], params["b4m"]], axis=1).astype(jnp.float32)

    out_cols = 1 + n_ev + 2 * z_dim
    out_width = _round_up(out_cols, 128)   # lane-dense output slab
    grid = (n_padded // rt,)

    def row_spec(d):
        return pl.BlockSpec((rt, d), lambda i: (i, 0))

    def full_spec(arr):
        return pl.BlockSpec(arr.shape, lambda i: (0,) * arr.ndim)

    kernel = functools.partial(
        _decoder_kernel, z_dim=z_dim, n_ev=n_ev, out_width=out_width,
        compute_dtype=compute_dtype)

    flops = 2 * n_padded * (n_in * n_hid + n_hid * 2 * z_dim
                            + z_dim * n_hid + n_hid * (1 + n_ev))
    transcendentals = n_padded * (2 * n_hid + 3 * z_dim + n_ev + 1)
    weight_bytes = sum(int(a.size) * a.dtype.itemsize
                       for a in (w1, b1, w2c, b2c, w3, b3, w4c, b4c))
    bytes_accessed = (int(x.size) * x.dtype.itemsize
                      + int(eps_noise.size) * 4
                      + weight_bytes
                      + n_padded * out_width * 4)

    out = pl.pallas_call(
        kernel,
        out_shape=jax.ShapeDtypeStruct((n_padded, out_width), jnp.float32),
        grid_spec=pltpu.PrefetchScalarGridSpec(
            num_scalar_prefetch=0,
            grid=grid,
            in_specs=[
                row_spec(n_in), row_spec(z_dim),
                full_spec(w1), full_spec(b1),
                full_spec(w2c), full_spec(b2c),
                full_spec(w3), full_spec(b3),
                full_spec(w4c), full_spec(b4c),
            ],
            out_specs=pl.BlockSpec((rt, out_width), lambda i: (i, 0)),
        ),
        compiler_params=pltpu.CompilerParams(
            dimension_semantics=("parallel",),
        ),
        cost_estimate=pl.CostEstimate(
            flops=int(flops),
            transcendentals=int(transcendentals),
            bytes_accessed=int(bytes_accessed),
        ),
    )(x, eps_noise, w1, b1, w2c, b2c, w3, b3, w4c, b4c)

    out = out[:n_rows]
    time_logits = out[:, 0:1]
    mark_logits = out[:, 1:1 + n_ev]
    mu = out[:, 1 + n_ev:1 + n_ev + z_dim]
    logvar = out[:, 1 + n_ev + z_dim:out_cols]

    # base_intensity is just a returned parameter (no compute) — glue.
    return {
        "time_logits": time_logits.reshape(*lead, 1),
        "mark_logits": mark_logits.reshape(*lead, n_ev),
        "base_intensity": params["intensity_b"],
        "mu": mu.reshape(*lead, z_dim),
        "logvar": logvar.reshape(*lead, z_dim),
    }


def init_params(key, n_in, n_hid, z_dim, num_event_types):
    """Deterministic synthetic init (Linear: W stored as (in, out))."""
    ks = jax.random.split(key, 12)

    def lin(kw, kb, fan_in, fan_out):
        bound = 1.0 / jnp.sqrt(fan_in)
        w = jax.random.uniform(kw, (fan_in, fan_out), jnp.float32, -bound, bound)
        b = jax.random.uniform(kb, (1, fan_out), jnp.float32, -bound, bound)
        return w, b

    w1, b1 = lin(ks[0], ks[1], n_in, n_hid)
    w21, b21 = lin(ks[2], ks[3], n_hid, z_dim)
    w22, b22 = lin(ks[4], ks[5], n_hid, z_dim)
    w3, b3 = lin(ks[6], ks[7], z_dim, n_hid)
    w4t, b4t = lin(ks[8], ks[9], n_hid, 1)
    w4m, b4m = lin(ks[10], ks[11], n_hid, num_event_types)
    return {
        "w1": w1, "b1": b1,
        "w21": w21, "b21": b21,
        "w22": w22, "b22": b22,
        "w3": w3, "b3": b3,
        "w4t": w4t, "b4t": b4t,
        "w4m": w4m, "b4m": b4m,
        "intensity_w": jnp.float32(0.1),
        "intensity_b": jnp.float32(0.1),
    }


def _reference_forward(x, noise, params):
    """Pure-JAX f32 reference for correctness checking."""
    eps = 1e-8
    h1_lin = x @ params["w1"] + params["b1"]
    h1 = h1_lin * jax.nn.sigmoid(h1_lin)
    mu = h1 @ params["w21"] + params["b21"]
    logvar = jax.nn.softplus(h1 @ params["w22"] + params["b22"]) + eps
    z = mu + noise * jnp.exp(0.5 * logvar)
    h3 = jax.nn.sigmoid(z @ params["w3"] + params["b3"])
    time_logits = h3 @ params["w4t"] + params["b4t"]
    mark_logits = jax.nn.log_softmax(h3 @ params["w4m"] + params["b4m"], axis=-1)
    return time_logits, mark_logits, mu, logvar


if __name__ == "__main__":
    # Small shapes: batch=2, seq=8 -> 16 token rows; n_in=32, n_hid=32,
    # z_dim=16, num_event_types=8.
    batch, seq = 2, 8
    n_in, n_hid, z_dim, num_event_types = 32, 32, 16, 8
    N = batch * seq

    key = jax.random.PRNGKey(0)
    k_param, k_x, k_noise = jax.random.split(key, 3)

    params = init_params(k_param, n_in, n_hid, z_dim, num_event_types)
    hidden_states = jax.random.normal(k_x, (batch, seq, n_in), jnp.float32)
    # reparameterization noise (epsilon ~ N(0, 1)), sampled deterministically
    noise = jax.random.normal(k_noise, (batch, seq, z_dim), jnp.float32)

    # Pure-JAX reference (f32).
    t_ref, m_ref, mu_ref, lv_ref = _reference_forward(
        hidden_states.reshape(N, n_in), noise.reshape(N, z_dim), params)

    # (a) f32 compute mode: tight numerical check.
    out32 = vae_tpp_decoder_forward(hidden_states, noise, params,
                                    compute_dtype=jnp.float32)
    jax.block_until_ready(out32)
    assert jnp.allclose(out32["time_logits"].reshape(N, 1), t_ref,
                        atol=1e-4, rtol=1e-4)
    assert jnp.allclose(out32["mark_logits"].reshape(N, num_event_types), m_ref,
                        atol=1e-4, rtol=1e-4)
    assert jnp.allclose(out32["mu"].reshape(N, z_dim), mu_ref,
                        atol=1e-4, rtol=1e-4)
    assert jnp.allclose(out32["logvar"].reshape(N, z_dim), lv_ref,
                        atol=1e-4, rtol=1e-4)

    # (b) default bf16 MXU mode (perf config): loose numerical check.
    out = vae_tpp_decoder_forward(hidden_states, noise, params)
    jax.block_until_ready(out)
    assert out["time_logits"].shape == (batch, seq, 1)
    assert out["mark_logits"].shape == (batch, seq, num_event_types)
    assert out["mu"].shape == (batch, seq, z_dim)
    assert out["logvar"].shape == (batch, seq, z_dim)
    assert jnp.allclose(out["time_logits"].reshape(N, 1), t_ref,
                        atol=5e-2, rtol=5e-2)
    assert jnp.allclose(out["mark_logits"].reshape(N, num_event_types), m_ref,
                        atol=5e-2, rtol=5e-2)
    assert jnp.allclose(out["mu"].reshape(N, z_dim), mu_ref,
                        atol=5e-2, rtol=5e-2)
    assert jnp.allclose(out["logvar"].reshape(N, z_dim), lv_ref,
                        atol=5e-2, rtol=5e-2)
    # log-probs must normalize (softmax correctness is independent of bf16 noise)
    assert jnp.allclose(jnp.sum(jnp.exp(out["mark_logits"]), axis=-1), 1.0,
                        atol=1e-2)

    print("KERNEL_OK")
</pallas_src>

<mosaic_0001>
module attributes {stable_mosaic.version = 11 : i64} {
  func.func @_decoder_kernel(%arg0: i32, %arg1: memref<16x32xf32, #tpu.memory_space<vmem>>, %arg2: memref<16x16xf32, #tpu.memory_space<vmem>>, %arg3: memref<32x32xf32, #tpu.memory_space<vmem>>, %arg4: memref<1x32xf32, #tpu.memory_space<vmem>>, %arg5: memref<32x32xf32, #tpu.memory_space<vmem>>, %arg6: memref<1x32xf32, #tpu.memory_space<vmem>>, %arg7: memref<16x32xf32, #tpu.memory_space<vmem>>, %arg8: memref<1x32xf32, #tpu.memory_space<vmem>>, %arg9: memref<32x9xf32, #tpu.memory_space<vmem>>, %arg10: memref<1x9xf32, #tpu.memory_space<vmem>>, %arg11: memref<16x128xf32, #tpu.memory_space<vmem>>) attributes {dimension_semantics = [#tpu.dimension_semantics<parallel>], iteration_bounds = array<i64: 1>, scalar_prefetch = 0 : i64, scratch_operands = 0 : i64, tpu.core_type = #tpu.core_type<tc>, window_params = [{transform_indices = @transform_0, window_bounds = array<i64: 16, 32>}, {transform_indices = @transform_1, window_bounds = array<i64: 16, 16>}, {pipeline_mode = #tpu.pipeline_mode<synchronous>, transform_indices = @transform_2, window_bounds = array<i64: 32, 32>}, {pipeline_mode = #tpu.pipeline_mode<synchronous>, transform_indices = @transform_3, window_bounds = array<i64: 1, 32>}, {pipeline_mode = #tpu.pipeline_mode<synchronous>, transform_indices = @transform_4, window_bounds = array<i64: 32, 32>}, {pipeline_mode = #tpu.pipeline_mode<synchronous>, transform_indices = @transform_5, window_bounds = array<i64: 1, 32>}, {pipeline_mode = #tpu.pipeline_mode<synchronous>, transform_indices = @transform_6, window_bounds = array<i64: 16, 32>}, {pipeline_mode = #tpu.pipeline_mode<synchronous>, transform_indices = @transform_7, window_bounds = array<i64: 1, 32>}, {pipeline_mode = #tpu.pipeline_mode<synchronous>, transform_indices = @transform_8, window_bounds = array<i64: 32, 9>}, {pipeline_mode = #tpu.pipeline_mode<synchronous>, transform_indices = @transform_9, window_bounds = array<i64: 1, 9>}, {transform_indices = @transform_10, window_bounds = array<i64: 16, 128>}]} {
    %c0 = arith.constant 0 : index
    %c0_0 = arith.constant 0 : index
    %0 = vector.load %arg1[%c0, %c0_0] : memref<16x32xf32, #tpu.memory_space<vmem>>, vector<16x32xf32>
    %c0_1 = arith.constant 0 : index
    %c0_2 = arith.constant 0 : index
    %1 = vector.load %arg3[%c0_1, %c0_2] : memref<32x32xf32, #tpu.memory_space<vmem>>, vector<32x32xf32>
    %cst = arith.constant dense<0.000000e+00> : vector<16x32xf32>
    %2 = tpu.matmul %0, %1, %cst {dimension_numbers = #tpu.dot_dimension_numbers<[1], [0], [0], [1], [0, 0, 1, 1], [], []>} : vector<16x32xf32>, vector<32x32xf32>, vector<16x32xf32> -> vector<16x32xf32>
    %c0_3 = arith.constant 0 : index
    %c0_4 = arith.constant 0 : index
    %3 = vector.load %arg4[%c0_3, %c0_4] : memref<1x32xf32, #tpu.memory_space<vmem>>, vector<1x32xf32>
    %4 = vector.broadcast %3 : vector<1x32xf32> to vector<16x32xf32>
    %5 = arith.addf %2, %4 : vector<16x32xf32>
    %cst_5 = arith.constant 5.000000e-01 : f32
    %6 = vector.broadcast %cst_5 : f32 to vector<16x32xf32>
    %7 = arith.mulf %6, %5 : vector<16x32xf32>
    %8 = math.tanh %7 : vector<16x32xf32>
    %cst_6 = arith.constant 1.000000e+00 : f32
    %9 = vector.broadcast %cst_6 : f32 to vector<16x32xf32>
    %10 = arith.addf %8, %9 : vector<16x32xf32>
    %cst_7 = arith.constant 5.000000e-01 : f32
    %11 = vector.broadcast %cst_7 : f32 to vector<16x32xf32>
    %12 = arith.mulf %11, %10 : vector<16x32xf32>
    %13 = arith.mulf %5, %12 : vector<16x32xf32>
    %c0_8 = arith.constant 0 : index
    %c0_9 = arith.constant 0 : index
    %14 = vector.load %arg5[%c0_8, %c0_9] : memref<32x32xf32, #tpu.memory_space<vmem>>, vector<32x32xf32>
    %cst_10 = arith.constant dense<0.000000e+00> : vector<16x32xf32>
    %15 = tpu.matmul %13, %14, %cst_10 {dimension_numbers = #tpu.dot_dimension_numbers<[1], [0], [0], [1], [0, 0, 1, 1], [], []>} : vector<16x32xf32>, vector<32x32xf32>, vector<16x32xf32> -> vector<16x32xf32>
    %c0_11 = arith.constant 0 : index
    %c0_12 = arith.constant 0 : index
    %16 = vector.load %arg6[%c0_11, %c0_12] : memref<1x32xf32, #tpu.memory_space<vmem>>, vector<1x32xf32>
    %17 = vector.broadcast %16 : vector<1x32xf32> to vector<16x32xf32>
    %18 = arith.addf %15, %17 : vector<16x32xf32>
    %19 = vector.extract_strided_slice %18 {offsets = [0, 0], sizes = [16, 16], strides = [1, 1]} : vector<16x32xf32> to vector<16x16xf32>
    %20 = vector.extract_strided_slice %18 {offsets = [0, 16], sizes = [16, 16], strides = [1, 1]} : vector<16x32xf32> to vector<16x16xf32>
    %cst_13 = arith.constant 2.000000e+01 : f32
    %21 = vector.broadcast %cst_13 : f32 to vector<16x16xf32>
    %22 = arith.cmpf ogt, %20, %21 : vector<16x16xf32>
    %cst_14 = arith.constant 2.000000e+01 : f32
    %23 = vector.broadcast %cst_14 : f32 to vector<16x16xf32>
    %24 = arith.minimumf %20, %23 : vector<16x16xf32>
    %25 = math.exp %24 : vector<16x16xf32>
    %26 = math.log1p %25 : vector<16x16xf32>
    %27 = arith.select %22, %20, %26 : vector<16x16xi1>, vector<16x16xf32>
    %cst_15 = arith.constant 9.99999993E-9 : f32
    %28 = vector.broadcast %cst_15 : f32 to vector<16x16xf32>
    %29 = arith.addf %27, %28 : vector<16x16xf32>
    %c0_16 = arith.constant 0 : index
    %c0_17 = arith.constant 0 : index
    %30 = vector.load %arg2[%c0_16, %c0_17] : memref<16x16xf32, #tpu.memory_space<vmem>>, vector<16x16xf32>
    %cst_18 = arith.constant 5.000000e-01 : f32
    %31 = vector.broadcast %cst_18 : f32 to vector<16x16xf32>
    %32 = arith.mulf %31, %29 : vector<16x16xf32>
    %33 = math.exp %32 : vector<16x16xf32>
    %34 = arith.mulf %30, %33 : vector<16x16xf32>
    %35 = arith.addf %19, %34 : vector<16x16xf32>
    %c0_19 = arith.constant 0 : index
    %c0_20 = arith.constant 0 : index
    %36 = vector.load %arg7[%c0_19, %c0_20] : memref<16x32xf32, #tpu.memory_space<vmem>>, vector<16x32xf32>
    %cst_21 = arith.constant dense<0.000000e+00> : vector<16x32xf32>
    %37 = tpu.matmul %35, %36, %cst_21 {dimension_numbers = #tpu.dot_dimension_numbers<[1], [0], [0], [1], [0, 0, 1, 1], [], []>} : vector<16x16xf32>, vector<16x32xf32>, vector<16x32xf32> -> vector<16x32xf32>
    %c0_22 = arith.constant 0 : index
    %c0_23 = arith.constant 0 : index
    %38 = vector.load %arg8[%c0_22, %c0_23] : memref<1x32xf32, #tpu.memory_space<vmem>>, vector<1x32xf32>
    %39 = vector.broadcast %38 : vector<1x32xf32> to vector<16x32xf32>
    %40 = arith.addf %37, %39 : vector<16x32xf32>
    %cst_24 = arith.constant 5.000000e-01 : f32
    %41 = vector.broadcast %cst_24 : f32 to vector<16x32xf32>
    %42 = arith.mulf %41, %40 : vector<16x32xf32>
    %43 = math.tanh %42 : vector<16x32xf32>
    %cst_25 = arith.constant 1.000000e+00 : f32
    %44 = vector.broadcast %cst_25 : f32 to vector<16x32xf32>
    %45 = arith.addf %43, %44 : vector<16x32xf32>
    %cst_26 = arith.constant 5.000000e-01 : f32
    %46 = vector.broadcast %cst_26 : f32 to vector<16x32xf32>
    %47 = arith.mulf %46, %45 : vector<16x32xf32>
    %c0_27 = arith.constant 0 : index
    %c0_28 = arith.constant 0 : index
    %48 = vector.load %arg9[%c0_27, %c0_28] : memref<32x9xf32, #tpu.memory_space<vmem>>, vector<32x9xf32>
    %cst_29 = arith.constant dense<0.000000e+00> : vector<16x9xf32>
    %49 = tpu.matmul %47, %48, %cst_29 {dimension_numbers = #tpu.dot_dimension_numbers<[1], [0], [0], [1], [0, 0, 1, 1], [], []>} : vector<16x32xf32>, vector<32x9xf32>, vector<16x9xf32> -> vector<16x9xf32>
    %c0_30 = arith.constant 0 : index
    %c0_31 = arith.constant 0 : index
    %50 = vector.load %arg10[%c0_30, %c0_31] : memref<1x9xf32, #tpu.memory_space<vmem>>, vector<1x9xf32>
    %51 = vector.broadcast %50 : vector<1x9xf32> to vector<16x9xf32>
    %52 = arith.addf %49, %51 : vector<16x9xf32>
    %53 = vector.extract_strided_slice %52 {offsets = [0, 0], sizes = [16, 1], strides = [1, 1]} : vector<16x9xf32> to vector<16x1xf32>
    %54 = vector.extract_strided_slice %52 {offsets = [0, 1], sizes = [16, 8], strides = [1, 1]} : vector<16x9xf32> to vector<16x8xf32>
    %cst_32 = arith.constant dense<0xFF800000> : vector<16xf32>
    %55 = vector.multi_reduction <maximumf>, %54, %cst_32 [1] : vector<16x8xf32> to vector<16xf32>
    %56 = vector.shape_cast %55 : vector<16xf32> to vector<16x1xf32>
    %57 = vector.broadcast %56 : vector<16x1xf32> to vector<16x8xf32>
    %58 = arith.subf %54, %57 : vector<16x8xf32>
    %59 = math.exp %58 : vector<16x8xf32>
    %cst_33 = arith.constant dense<0.000000e+00> : vector<16xf32>
    %60 = vector.multi_reduction <add>, %59, %cst_33 [1] : vector<16x8xf32> to vector<16xf32>
    %61 = vector.shape_cast %60 : vector<16xf32> to vector<16x1xf32>
    %62 = math.log %61 : vector<16x1xf32>
    %63 = vector.broadcast %62 : vector<16x1xf32> to vector<16x8xf32>
    %64 = arith.subf %58, %63 : vector<16x8xf32>
    %c0_34 = arith.constant 0 : index
    %c0_35 = arith.constant 0 : index
    %65 = vector.load %arg11[%c0_34, %c0_35] : memref<16x128xf32, #tpu.memory_space<vmem>>, vector<16x1xf32>
    tpu.vector_store %arg11[%c0_34, %c0_35], %53 {strides = array<i32>} : memref<16x128xf32, #tpu.memory_space<vmem>>, vector<16x1xf32>,
    %c0_36 = arith.constant 0 : index
    %c1 = arith.constant 1 : index
    %66 = vector.load %arg11[%c0_36, %c1] : memref<16x128xf32, #tpu.memory_space<vmem>>, vector<16x8xf32>
    tpu.vector_store %arg11[%c0_36, %c1], %64 {strides = array<i32>} : memref<16x128xf32, #tpu.memory_space<vmem>>, vector<16x8xf32>,
    %c0_37 = arith.constant 0 : index
    %c9 = arith.constant 9 : index
    %67 = vector.load %arg11[%c0_37, %c9] : memref<16x128xf32, #tpu.memory_space<vmem>>, vector<16x16xf32>
    tpu.vector_store %arg11[%c0_37, %c9], %19 {strides = array<i32>} : memref<16x128xf32, #tpu.memory_space<vmem>>, vector<16x16xf32>,
    %c0_38 = arith.constant 0 : index
    %c25 = arith.constant 25 : index
    %68 = vector.load %arg11[%c0_38, %c25] : memref<16x128xf32, #tpu.memory_space<vmem>>, vector<16x16xf32>
    tpu.vector_store %arg11[%c0_38, %c25], %29 {strides = array<i32>} : memref<16x128xf32, #tpu.memory_space<vmem>>, vector<16x16xf32>,
    %cst_39 = arith.constant 0.000000e+00 : f32
    %69 = vector.broadcast %cst_39 : f32 to vector<16x87xf32>
    %c0_40 = arith.constant 0 : index
    %c41 = arith.constant 41 : index
    %70 = vector.load %arg11[%c0_40, %c41] : memref<16x128xf32, #tpu.memory_space<vmem>>, vector<16x87xf32>
    tpu.vector_store %arg11[%c0_40, %c41], %69 {strides = array<i32>} : memref<16x128xf32, #tpu.memory_space<vmem>>, vector<16x87xf32>,
    return
  }
  func.func @transform_0(%arg0: i32) -> (i32, i32) {
    %c0_i32 = arith.constant 0 : i32
    %c0_i32_0 = arith.constant 0 : i32
    return %arg0, %c0_i32 : i32, i32
  }
  func.func @transform_1(%arg0: i32) -> (i32, i32) {
    %c0_i32 = arith.constant 0 : i32
    %c0_i32_0 = arith.constant 0 : i32
    return %arg0, %c0_i32 : i32, i32
  }
  func.func @transform_2(%arg0: i32) -> (i32, i32) {
    %c0_i32 = arith.constant 0 : i32
    %c0_i32_0 = arith.constant 0 : i32
    %c0_i32_1 = arith.constant 0 : i32
    return %c0_i32, %c0_i32_0 : i32, i32
  }
  func.func @transform_3(%arg0: i32) -> (i32, i32) {
    %c0_i32 = arith.constant 0 : i32
    %c0_i32_0 = arith.constant 0 : i32
    %c0_i32_1 = arith.constant 0 : i32
    return %c0_i32, %c0_i32_0 : i32, i32
  }
  func.func @transform_4(%arg0: i32) -> (i32, i32) {
    %c0_i32 = arith.constant 0 : i32
    %c0_i32_0 = arith.constant 0 : i32
    %c0_i32_1 = arith.constant 0 : i32
    return %c0_i32, %c0_i32_0 : i32, i32
  }
  func.func @transform_5(%arg0: i32) -> (i32, i32) {
    %c0_i32 = arith.constant 0 : i32
    %c0_i32_0 = arith.constant 0 : i32
    %c0_i32_1 = arith.constant 0 : i32
    return %c0_i32, %c0_i32_0 : i32, i32
  }
  func.func @transform_6(%arg0: i32) -> (i32, i32) {
    %c0_i32 = arith.constant 0 : i32
    %c0_i32_0 = arith.constant 0 : i32
    %c0_i32_1 = arith.constant 0 : i32
    return %c0_i32, %c0_i32_0 : i32, i32
  }
  func.func @transform_7(%arg0: i32) -> (i32, i32) {
    %c0_i32 = arith.constant 0 : i32
    %c0_i32_0 = arith.constant 0 : i32
    %c0_i32_1 = arith.constant 0 : i32
    return %c0_i32, %c0_i32_0 : i32, i32
  }
  func.func @transform_8(%arg0: i32) -> (i32, i32) {
    %c0_i32 = arith.constant 0 : i32
    %c0_i32_0 = arith.constant 0 : i32
    %c0_i32_1 = arith.constant 0 : i32
    return %c0_i32, %c0_i32_0 : i32, i32
  }
  func.func @transform_9(%arg0: i32) -> (i32, i32) {
    %c0_i32 = arith.constant 0 : i32
    %c0_i32_0 = arith.constant 0 : i32
    %c0_i32_1 = arith.constant 0 : i32
    return %c0_i32, %c0_i32_0 : i32, i32
  }
  func.func @transform_10(%arg0: i32) -> (i32, i32) {
    %c0_i32 = arith.constant 0 : i32
    %c0_i32_0 = arith.constant 0 : i32
    return %arg0, %c0_i32 : i32, i32
  }
}

</mosaic_0001>

<bundles_post_ra>
// kernel: tpu_custom_call.1
= control target key start
LH: loop header
LB: loop body
LE: loop exit
PB: predicated region body
PF: predicated region fallthrough
CT: control target
= control target key end

     0   :  { %15 = vsyncpa [#allocation3], 0  ;;  %s1041_s0 = inlined_call_operand.vmem [shape: f32[16,32], index: 0, kind: input, shape index: {}]   ;;  %s1042_s1 = inlined_call_operand.hbm [shape: f32[16,16], index: 1, kind: input, shape index: {}]   ;;  %s1043_s2 = inlined_call_operand.vmem [shape: f32[32,32], index: 2, kind: input, shape index: {}]   ;;  %s1044_s3 = inlined_call_operand.vmem [shape: f32[1,32], index: 3, kind: input, shape index: {}]   ;;  %s1045_s4 = inlined_call_operand.hbm [shape: f32[32,32], index: 4, kind: input, shape index: {}]   ;;  %s1046_s5 = inlined_call_operand.vmem [shape: f32[1,32], index: 5, kind: input, shape index: {}]   ;;  %s1047_s6 = inlined_call_operand.hbm [shape: f32[16,32], index: 6, kind: input, shape index: {}]   ;;  %s1048_s7 = inlined_call_operand.vmem [shape: f32[1,32], index: 7, kind: input, shape index: {}]   ;;  %s1049_s8 = inlined_call_operand.vmem [shape: f32[32,9], index: 8, kind: input, shape index: {}]   ;;  %s1050_s9 = inlined_call_operand.vmem [shape: f32[1,9], index: 9, kind: input, shape index: {}]   ;;  %s1051_s10 = inlined_call_operand.hbm [shape: f32[16,128], index: 10, kind: output, shape index: {}]  }
   0x1   :  { %16 = vsyncpa [#allocation6], 0 }
   0x2   :  { %17 = vsyncpa [#allocation4], 0  ;;  %s831_s13 = smov [#allocation5]   ;;  %s832_s15 = smov [#allocation2]  }
   0x3   :  { %s41_s14 = sshll.u32 %s831_s13, 4  ;;  %s25_s16 = sshll.u32 %s832_s15, 4  ;;  %s42_s14 = int_to_ptr.vmem [resolvable:$true] %s41_s14  ;;  %s896_s16 = int_to_ptr.vmem [resolvable:$true] %s25_s16 }
   0x4   :  { %s737_s19 = scalar_lea.hbm %s1045_s4, 512 }
   0x5   :  { %p738_p0 = scmp.ne.s32.totalorder %s1045_s4, %s737_s19  ;;  %p741_p1 = scmp.lt.u32.totalorder %s737_s19, %s1045_s4 }
   0x7   :  { %p743_p2 = pnand %p741_p1, %p738_p0 }
   0x9   :  { %746 = shalt.err (!%p743_p2)
}
   0xa   :  { %s747_s24 = scalar_lea.vmem %s42_s14, 512  ;;  %p752_p4 = scmp.lt.s32.totalorder %s42_s14, %s42_s14 }
   0xb   :  { %p748_p3 = scmp.ne.s32.totalorder %s42_s14, %s747_s24  ;;  %p753_p5 = scmp.lt.s32.totalorder %s747_s24, %s747_s24 }
   0xd   :  { %p754_p6 = por %p753_p5, %p752_p4 }
   0xf   :  { %p755_p7 = pnand %p754_p6, %p748_p3 }
  0x11   :  { %758 = shalt.err (!%p755_p7)
}
  0x12   :  { %s833_s25 = smov 128   ;;  %s834_s26 = smov 8  }
  0x13   :  { %47 = dma.hbm_to_vmem [thread:$0]  %s1045_s4, 512, %s42_s14, [#allocation6], %s833_s25, %s833_s25, %s834_s26  }
  0x14   :  { %s759_s11 = scalar_lea.hbm %s1042_s1, 256 }
  0x15   :  { %p760_p8 = scmp.ne.s32.totalorder %s1042_s1, %s759_s11  ;;  %p763_p9 = scmp.lt.u32.totalorder %s759_s11, %s1042_s1 }
  0x17   :  { %p765_p10 = pnand %p763_p9, %p760_p8 }
  0x19   :  { %768 = shalt.err (!%p765_p10)
}
  0x1a   :  { %s769_s18 = scalar_lea.vmem %s896_s16, 256  ;;  %p774_p12 = scmp.lt.s32.totalorder %s896_s16, %s896_s16 }
  0x1b   :  { %p770_p11 = scmp.ne.s32.totalorder %s896_s16, %s769_s18  ;;  %p775_p13 = scmp.lt.s32.totalorder %s769_s18, %s769_s18 }
  0x1d   :  { %p776_p0 = por %p775_p13, %p774_p12 }
  0x1f   :  { %p777_p1 = pnand %p776_p0, %p770_p11 }
  0x21   :  { %780 = shalt.err (!%p777_p1)
}
  0x22   :  { %31 = dma.hbm_to_vmem [thread:$0]  %s1042_s1, 256, %s896_s16, [#allocation3], %s833_s25, %s833_s25, %s834_s26  }
  0x23   :  { %s835_s19 = smov [#allocation7]   ;;  %s781_s23 = scalar_lea.hbm %s1047_s6, 256 }
  0x24   :  { %s55_s20 = sshll.u32 %s835_s19, 4  ;;  %p782_p2 = scmp.ne.s32.totalorder %s1047_s6, %s781_s23  ;;  %s56_s20 = int_to_ptr.vmem [resolvable:$true] %s55_s20 }
  0x25   :  { %p785_p3 = scmp.lt.u32.totalorder %s781_s23, %s1047_s6 }
  0x27   :  { %p787_p4 = pnand %p785_p3, %p782_p2 }
  0x29   :  { %790 = shalt.err (!%p787_p4)
}
  0x2a   :  { %s791_s30 = scalar_lea.vmem %s56_s20, 256  ;;  %p796_p6 = scmp.lt.s32.totalorder %s56_s20, %s56_s20 }
  0x2b   :  { %p792_p5 = scmp.ne.s32.totalorder %s56_s20, %s791_s30  ;;  %p797_p7 = scmp.lt.s32.totalorder %s791_s30, %s791_s30 }
  0x2d   :  { %p798_p8 = por %p797_p7, %p796_p6 }
  0x2f   :  { %p799_p9 = pnand %p798_p8, %p792_p5 }
  0x31   :  { %802 = shalt.err (!%p799_p9)
}
  0x32   :  { %61 = dma.hbm_to_vmem [thread:$0]  %s1047_s6, 256, %s56_s20, [#allocation6], %s833_s25, %s833_s25, %s834_s26  }
  0x33   :  { %825 = dma.done.wait [#allocation3], 256  }
  0x34   :  { %826 = vsyncadd [#allocation3], 4294967040 }
  0x35   :  { %827 = dma.done.wait [#allocation6], 768  }
  0x36   :  { %828 = vsyncadd [#allocation6], 4294966528  ;;  %vm90_vm0 = vcmask 261120   ;;  %v79_v0 = vld [vmem:[%s1043_s2] sm:$0xff]  ;;  %v80_v1 = vld [vmem:[%s1043_s2 + $0x8] sm:$0xff]  ;;  %vm333_vm5 = vcmask 130048  }
  0x37   :  { %v81_v2 = vld [vmem:[%s1043_s2 + $0x10] sm:$0xff]  ;;  %v671_v3 = vpack.c.bf16 %v80_v1, %v79_v0  ;;  %v82_v4 = vld [vmem:[%s1043_s2 + $0x18] sm:$0xff]  ;;  %v77_v5 = vld [vmem:[%s1041_s0] sm:$0xff]  ;;  %vm549_vm6 = vcmask 7168   ;;  %vm515_vm7 = vcmask 72712   ;;  %s838_s13 = smov 9  }
  0x38   :  { %v675_v6 = vpack.c.bf16 %v82_v4, %v81_v2  ;;  %639 = vmatprep.mubr.msk.f32.mxu0 %vm90_vm0, %v77_v5  ;;  %v78_v7 = vld [vmem:[%s1041_s0 + $0x8] sm:$0xff]  ;;  %v182_v8 = vld [vmem:[#allocation5] sm:$0xff]  ;;  %v183_v9 = vld [vmem:[#allocation5 + $0x8] sm:$0xff]  ;;  %vm536_vm8 = vcmask 64512   ;;  %vm562_vm9 = vcmask 203848   ;;  %vm573_vm10 = vcmask 335048  }
  0x39   :  { %672 = vmatprep.subr.bf16.mxu0 %v671_v3  ;;  %v679_v10 = vpack.c.bf16 %v183_v9, %v182_v8  ;;  %v184_v11 = vld [vmem:[#allocation5 + $0x10] sm:$0xff]  ;;  %v185_v12 = vld [vmem:[#allocation5 + $0x18] sm:$0xff]  ;;  %v324_v63 = vld [vmem:[#allocation7] sm:$0xff]  ;;  %vm576_vm11 = vcmask 1047880   ;;  %s839_s15 = smov [#allocation8]  }
  0x3a   :  { %674 = vmatpush3.bf16.msra.mxu0 %v671_v3  ;;  %v683_v13 = vpack.c.bf16 %v185_v12, %v184_v11  ;;  %v597_v14 = vld [vmem:[%s1044_s3] ss:$0 sm:$0xff]  ;;  %v325_v0 = vld [vmem:[#allocation7 + $0x8] sm:$0xff]  ;;  %v305_v8 = vld [vmem:[#allocation2 + $0x8] sm:$0xff]  ;;  %s584_s17 = sshll.u32 %s839_s15, 4  ;;  %s585_s17 = int_to_ptr.vmem [resolvable:$true] %s584_s17 }
  0x3b   :  { %676 = vmatprep.subr.bf16.mxu0 %v675_v6  ;;  %680 = vmatprep.subr.bf16.mxu1 %v679_v10  ;;  %v600_v29 = vld [vmem:[%s1046_s5] ss:$0 sm:$0xff]  ;;  %v687_v2 = vpack.c.bf16 %v325_v0, %v324_v63  ;;  %s836_s5 = smov 112   ;;  %s803_s18 = scalar_lea.vmem %s585_s17, 256 }
  0x3c   :  { %682 = vmatpush3.bf16.msra.mxu1 %v679_v10  ;;  %v304_v5 = vld [vmem:[#allocation2] sm:$0xff]  ;;  %p804_p10 = scmp.ne.s32.totalorder %s585_s17, %s803_s18  ;;  %p808_p11 = scmp.lt.s32.totalorder %s585_s17, %s585_s17 }
  0x3d   :  { %684 = vmatprep.subr.bf16.mxu1 %v683_v13  ;;  %p809_p12 = scmp.lt.s32.totalorder %s803_s18, %s803_s18 }
  0x3e   :  { %678 = vmatpush3.bf16.msra.mxu0 %v675_v6 }
  0x3f   :  { %688 = vmatprep.subr.bf16.mxu0 %v687_v2  ;;  %p810_p13 = por %p809_p12, %p808_p11 }
  0x40   :  { %686 = vmatpush3.bf16.msra.mxu1 %v683_v13  ;;  %v423_v13 = vld [vmem:[%s1049_s8] sm:$0xff] }
  0x41   :  { %640 = vmatmul.mubr.msk.f32.vlgmr.msra.gmra.mrb[0].mxu0 %vm90_vm0, %v78_v7  ;;  %p811_p0 = pnand %p810_p13, %p804_p10 }
  0x42   :  { %690 = vmatpush3.bf16.msra.mxu0 %v687_v2 }
 0x114   :  { %v641_v15 = vpop.f32.mrb[0].mxu0 }
 0x115   :  { %v169_v16 = vadd.f32 %v641_v15, %v597_v14  ;;  %v163_v17 = vpop.f32.mrb[1].mxu0 }
 0x116   :  { %v164_v18 = vadd.f32 %v597_v14, %v163_v17  ;;  %v424_v14 = vld [vmem:[%s1049_s8 + $0x8] sm:$0xff]  ;;  %v426_v17 = vld [vmem:[%s1049_s8 + $0x18] sm:$0xff] }
 0x117   :  { %v173_v19 = vmul.f32 0.5, %v169_v16  ;;  %v691_v15 = vpack.c.bf16 %v424_v14, %v423_v13 }
 0x118   :  { %v172_v20 = vmul.f32 0.5, %v164_v18 }
 0x119   :  { %709 = vtanh.f32 %v173_v19  ;;  %692 = vmatprep.subr.bf16.mxu1 %v691_v15  ;;  %v603_v19 = vld [vmem:[%s1048_s7] ss:$0 sm:$0xff] }
 0x11a   :  { %711 = vtanh.f32 %v172_v20 }
 0x123   :  { %v710_v21 = vpop.eup %709 }
 0x124   :  { %v712_v22 = vpop.eup %711  ;;  %v177_v23 = vadd.f32 1.0, %v710_v21 }
 0x125   :  { %v176_v24 = vadd.f32 1.0, %v712_v22 }
 0x126   :  { %v179_v25 = vmul.f32 0.5, %v177_v23 }
 0x127   :  { %v178_v26 = vmul.f32 0.5, %v176_v24 }
 0x128   :  { %v181_v28 = vmul.f32 %v179_v25, %v169_v16  ;;  %v425_v16 = vld [vmem:[%s1049_s8 + $0x10] sm:$0xff] }
 0x129   :  { %v180_v27 = vmul.f32 %v178_v26, %v164_v18  ;;  %v695_v18 = vpack.c.bf16 %v426_v17, %v425_v16 }
 0x12b   :  { %650 = vmatprep.mubr.msk.f32.mxu1 %vm90_vm0, %v180_v27 }
 0x12c   :  { %651 = vmatmul.mubr.msk.f32.vlgmr.msra.gmra.mrb[0].mxu1 %vm90_vm0, %v181_v28 }
 0x12d   :  { %694 = vmatpush3.bf16.msra.mxu1 %v691_v15 }
 0x12e   :  { %696 = vmatprep.subr.bf16.mxu1 %v695_v18 }
 0x131   :  { %698 = vmatpush3.bf16.msra.mxu1 %v695_v18 }
 0x1ff   :  { %v652_v30 = vpop.f32.mrb[0].mxu1 }
 0x200   :  { %v976_v31 = vadd.f32 %v652_v30, %v600_v29  ;;  %v265_v32 = vpop.f32.mrb[1].mxu1 }
 0x201   :  { %v978_v33 = vadd.f32 %v600_v29, %v265_v32 }
 0x202   :  { %v277_v34 = vmin.f32 %v976_v31, 20.0  ;;  %vm275_vm2 = vcmp.gt.f32.partialorder %v976_v31, 20.0 }
 0x203   :  { %v276_v35 = vmin.f32 %v978_v33, 20.0  ;;  %vm274_vm4 = vcmp.gt.f32.partialorder %v978_v33, 20.0 }
 0x204   :  { %v280_v36 = vmul.f32 1.442695, %v277_v34  ;;  %v606_v34 = vld [vmem:[%s1050_s9] ss:$0 sm:$0xff]  ;;  %s837_s9 = smov 127  }
 0x205   :  { %v278_v37 = vmul.f32 1.442695, %v276_v35 }
 0x206   :  { %713 = vpow2.f32 %v280_v36 }
 0x207   :  { %715 = vpow2.f32 %v278_v37 }
 0x210   :  { %v714_v38 = vpop.eup %713 }
 0x211   :  { %v716_v39 = vpop.eup %715  ;;  %v291_v40 = vadd.f32 1.0, %v714_v38  ;;  %v294_v42 = vmul.f32 -0.5, %v714_v38  ;;  %v297_v45 = vand.u32 2147483647, %v714_v38 }
 0x212   :  { %v282_v41 = vadd.f32 1.0, %v716_v39  ;;  %v285_v43 = vmul.f32 -0.5, %v716_v39  ;;  %v288_v47 = vand.u32 2147483647, %v716_v39 }
 0x213   :  { %717 = vlog2.f32 %v291_v40  ;;  %v295_v44 = vadd.f32 1.0, %v294_v42  ;;  %vm298_vm1 = vcmp.lt.f32.partialorder %v297_v45, 0.0004427343 }
 0x214   :  { %719 = vlog2.f32 %v282_v41  ;;  %v286_v46 = vadd.f32 1.0, %v285_v43  ;;  %vm289_vm3 = vcmp.lt.f32.partialorder %v288_v47, 0.0004427343 }
 0x215   :  { %v296_v51 = vmul.f32 %v714_v38, %v295_v44 }
 0x216   :  { %v287_v53 = vmul.f32 %v716_v39, %v286_v46 }
 0x21d   :  { %v718_v48 = vpop.eup %717 }
 0x21e   :  { %v720_v49 = vpop.eup %719  ;;  %v293_v50 = vmul.f32 0.6931472, %v718_v48 }
 0x21f   :  { %v284_v52 = vmul.f32 0.6931472, %v720_v49 }
 0x220   :  { %v299_v54 = vsel %vm298_vm1, %v296_v51, %v293_v50 }
 0x221   :  { %v301_v55 = vsel %vm275_vm2, %v976_v31, %v299_v54  ;;  %v290_v56 = vsel %vm289_vm3, %v287_v53, %v284_v52 }
 0x222   :  { %v985_v57 = vadd.f32 1e-08, %v301_v55  ;;  %v300_v58 = vsel %vm274_vm4, %v978_v33, %v290_v56 }
 0x223   :  { %v988_v59 = vadd.f32 1e-08, %v300_v58 }
 0x224   :  { %v307_v60 = vmul.f32 0.5, %v985_v57 }
 0x225   :  { %v306_v61 = vmul.f32 0.5, %v988_v59 }
 0x226   :  { %v310_v1 = vmul.f32 1.442695, %v307_v60 }
 0x227   :  { %v308_v62 = vmul.f32 1.442695, %v306_v61 }
 0x229   :  { %721 = vpow2.f32 %v308_v62 }
 0x22a   :  { %723 = vpow2.f32 %v310_v1 }
 0x233   :  { %v722_v3 = vpop.eup %721 }
 0x234   :  { %314 = vrot.lane.b32.xlu0 %v722_v3, %s836_s5  ;;  %v724_v4 = vpop.eup %723 }
 0x238   :  { %316 = vrot.lane.b32.xlu0 %v724_v4, %s836_s5 }
 0x2a6   :  { %v315_v6 = vpop.permute.xlu0 %314 }
 0x2a7   :  { %v320_v7 = vmul.f32 %v315_v6, %v304_v5 }
 0x2a9   :  { %v322_v9 = vadd.f32 %v320_v7, %v978_v33 }
 0x2aa   :  { %v317_v10 = vpop.permute.xlu0 %316 }
 0x2ab   :  { %v321_v11 = vmul.f32 %v317_v10, %v305_v8  ;;  %657 = vmatprep.mubr.msk.f32.mxu0 %vm333_vm5, %v322_v9 }
 0x2ad   :  { %v323_v12 = vadd.f32 %v321_v11, %v976_v31 }
 0x2af   :  { %658 = vmatmul.mubr.msk.f32.vlgmr.msra.gmra.mrb[2].mxu0 %vm333_vm5, %v323_v12 }
 0x382   :  { %v659_v20 = vpop.f32.mrb[2].mxu0 }
 0x383   :  { %v412_v21 = vadd.f32 %v659_v20, %v603_v19  ;;  %v406_v22 = vpop.f32.mrb[3].mxu0 }
 0x384   :  { %v407_v23 = vadd.f32 %v603_v19, %v406_v22 }
 0x385   :  { %v416_v24 = vmul.f32 0.5, %v412_v21 }
 0x386   :  { %v415_v25 = vmul.f32 0.5, %v407_v23 }
 0x387   :  { %725 = vtanh.f32 %v416_v24 }
 0x388   :  { %727 = vtanh.f32 %v415_v25 }
 0x391   :  { %v726_v26 = vpop.eup %725 }
 0x392   :  { %v728_v27 = vpop.eup %727  ;;  %v420_v28 = vadd.f32 1.0, %v726_v26 }
 0x393   :  { %v419_v29 = vadd.f32 1.0, %v728_v27 }
 0x394   :  { %v422_v32 = vmul.f32 0.5, %v420_v28 }
 0x395   :  { %v421_v30 = vmul.f32 0.5, %v419_v29 }
 0x397   :  { %668 = vmatprep.mubr.msk.f32.mxu1 %vm90_vm0, %v421_v30 }
 0x398   :  { %669 = vmatmul.mubr.msk.f32.vlgmr.msra.gmra.mrb[2].mxu1 %vm90_vm0, %v422_v32 }
 0x46b   :  { %v670_v35 = vpop.f32.mrb[2].mxu1 }
 0x46c   :  { %v512_v36 = vadd.f32 %v670_v35, %v606_v34  ;;  %v506_v37 = vpop.f32.mrb[3].mxu1 }
 0x46d   :  { %v507_v38 = vadd.f32 %v606_v34, %v506_v37 }
 0x46e   :  { %551 = vst.msk [vmem:[#allocation8 + $0x8] sm:$0xff] %vm549_vm6, %v512_v36  ;;  %v519_v40 = vsel %vm515_vm7, %v512_v36, -inf }
 0x46f   :  { %550 = vst.msk [vmem:[#allocation8] sm:$0xff] %vm549_vm6, %v507_v38  ;;  %v516_v39 = vsel %vm515_vm7, %v507_v38, -inf }
 0x470   :  { %517 = vmax.xlane.f32.xlu1 %v516_v39 }
 0x474   :  { %520 = vmax.xlane.f32.xlu1 %v519_v40 }
 0x4fd   :  { %v518_v41 = vpop.xlane.xlu1 %517 }
 0x4fe   :  { %v522_v42 = vsub.f32 %v507_v38, %v518_v41 }
 0x500   :  { %v524_v43 = vmul.f32 1.442695, %v522_v42 }
 0x501   :  { %v521_v44 = vpop.xlane.xlu1 %520 }
 0x502   :  { %729 = vpow2.f32 %v524_v43  ;;  %v523_v45 = vsub.f32 %v512_v36, %v521_v44 }
 0x504   :  { %v526_v46 = vmul.f32 1.442695, %v523_v45 }
 0x506   :  { %731 = vpow2.f32 %v526_v46 }
 0x50c   :  { %v730_v47 = vpop.eup %729 }
 0x50d   :  { %530 = vrot.lane.b32.xlu0 %v730_v47, %s837_s9 }
 0x510   :  { %v732_v48 = vpop.eup %731 }
 0x511   :  { %556 = vrot.lane.b32.xlu0 %v978_v33, %s838_s13  ;;  %532 = vrot.lane.b32.xlu1 %v732_v48, %s837_s9 }
 0x515   :  { %567 = vrot.lane.b32.xlu0 %v988_v59, %s838_s13 }
 0x57f   :  { %v531_v49 = vpop.permute.xlu0 %530 }
 0x580   :  { %v537_v50 = vsel %vm536_vm8, %v531_v49, 0.0 }
 0x581   :  { %538 = vadd.xlane.f32.xlu0 %v537_v50 }
 0x583   :  { %v533_v51 = vpop.permute.xlu1 %532  ;;  %v557_v53 = vpop.permute.xlu0 %556 }
 0x584   :  { %v540_v52 = vsel %vm536_vm8, %v533_v51, 0.0 }
 0x585   :  { %541 = vadd.xlane.f32.xlu1 %v540_v52 }
 0x587   :  { %v568_v54 = vpop.permute.xlu0 %567 }
 0x596   :  { %558 = vrot.lane.b32.xlu1 %v976_v31, %s838_s13 }
 0x597   :  { %569 = vrot.lane.b32.xlu0 %v985_v57, %s838_s13  ;;  %v840_v57 = vmov 0.0  }
 0x60e   :  { %v539_v55 = vpop.xlane.xlu0 %538 }
 0x60f   :  { %733 = vlog2.f32 %v539_v55 }
 0x612   :  { %v542_v56 = vpop.xlane.xlu1 %541  ;;  %v570_v63 = vpop.permute.xlu0 %569 }
 0x613   :  { %735 = vlog2.f32 %v542_v56 }
 0x616   :  { %v559_v62 = vpop.permute.xlu1 %558 }
 0x619   :  { %v734_v33 = vpop.eup %733 }
 0x61a   :  { %v544_v58 = vmul.f32 0.6931472, %v734_v33 }
 0x61c   :  { %v547_v59 = vsub.f32 %v522_v42, %v544_v58 }
 0x61d   :  { %v736_v60 = vpop.eup %735 }
 0x61e   :  { %552 = vst.msk [vmem:[#allocation8] sm:$0xff] %vm515_vm7, %v547_v59  ;;  %v546_v61 = vmul.f32 0.6931472, %v736_v60 }
 0x61f   :  { %563 = vst.msk [vmem:[#allocation8] sm:$0xff] %vm562_vm9, %v557_v53 }
 0x620   :  { %v548_v31 = vsub.f32 %v523_v45, %v546_v61  ;;  %574 = vst.msk [vmem:[#allocation8] sm:$0xff] %vm573_vm10, %v568_v54 }
 0x621   :  { %577 = vst.msk [vmem:[#allocation8] sm:$0xff] %vm576_vm11, %v840_v57 }
 0x622   :  { %553 = vst.msk [vmem:[#allocation8 + $0x8] sm:$0xff] %vm515_vm7, %v548_v31 }
 0x623   :  { %564 = vst.msk [vmem:[#allocation8 + $0x8] sm:$0xff] %vm562_vm9, %v559_v62 }
 0x624   :  { %575 = vst.msk [vmem:[#allocation8 + $0x8] sm:$0xff] %vm573_vm10, %v570_v63 }
 0x625   :  { %578 = vst.msk [vmem:[#allocation8 + $0x8] sm:$0xff] %vm576_vm11, %v840_v57 }
 0x626   :  { %814 = shalt.err (!%p811_p0)
}
 0x627   :  { %s815_s14 = scalar_lea.hbm %s1051_s10, 256 }
 0x628   :  { %p816_p1 = scmp.ne.s32.totalorder %s1051_s10, %s815_s14  ;;  %p819_p2 = scmp.lt.u32.totalorder %s815_s14, %s1051_s10 }
 0x62a   :  { %p821_p3 = pnand %p819_p2, %p816_p1 }
 0x62c   :  { %824 = shalt.err (!%p821_p3)
}
 0x62d   :  { %590 = dma.vmem_to_hbm [thread:$0]  %s585_s17, 256, %s1051_s10, [#allocation4], %s833_s25, %s833_s25, %s834_s26  }
 0x62e   :  { %829 = dma.done.wait [#allocation4], 256  }
 0x62f   :  { %830 = vsyncadd [#allocation4], 4294967040 }
 0x630   :  { %594 = vsyncpa [#allocation3], 1 }
 0x631   :  { %595 = vsyncpa [#allocation6], 1 }
 0x632   :  { %596 = vsyncpa [#allocation4], 1 }

</bundles_post_ra>
